<compile_context>
chip_gen: v5e
topology: v5e:2x2
jax: 0.10.0
libtpu: 0.0.40
codegen_flags: <defaults>
</compile_context>

<pallas_src>
import functools

import jax
import jax.numpy as jnp
from jax.experimental import pallas as pl
from jax.experimental.pallas import tpu as pltpu


def _round_up(n, m):
    return ((n + m - 1) // m) * m


def mlp_kernel(x_ref, w1_ref, b1_ref, w2_ref, b2_ref, w3_ref, b3_ref, out_ref):
    # x_ref: [obs_dim, TM]  (batch on lanes).  Weights are PyTorch layout [out, in],
    # biases [out, 1] (broadcast along the lane/batch axis).  Accumulate in f32.
    xt = x_ref[...]
    h1 = jnp.dot(w1_ref[...], xt, preferred_element_type=jnp.float32) + b1_ref[...]
    h1 = jnp.maximum(h1, 0.0)                                   # relu (f32 on VPU)
    h2 = jnp.dot(w2_ref[...], h1.astype(w2_ref.dtype),
                 preferred_element_type=jnp.float32) + b2_ref[...]
    h2 = jnp.maximum(h2, 0.0)                                   # relu
    h3 = jnp.dot(w3_ref[...], h2.astype(w3_ref.dtype),
                 preferred_element_type=jnp.float32) + b3_ref[...]
    out_ref[...] = jnp.tanh(h3).astype(out_ref.dtype)           # tanh (EUP)


def custom_policy_forward(x, params, *, block_batch=2048, stream_dtype=None):
    """x: [batch, obs_dim] f32.  params: PyTorch-layout weights w{1,2,3}=[out,in], b{1,2,3}=[out,1].

    block_batch: batch-tile size (rounded to a multiple of 128 lanes).
    stream_dtype: optional storage dtype (e.g. jnp.bfloat16) for x and weights; compute stays f32.
    """
    batch, obs_dim = x.shape
    act_dim = params["w3"].shape[0]

    # Batch tile: multiple of 128 (lane width); pad batch up to a multiple of the tile.
    tm = min(_round_up(block_batch, 128), _round_up(batch, 128))
    padded = _round_up(batch, tm)

    x_t = x.T                                    # [obs_dim, batch]  (layout plumbing in XLA)
    if padded != batch:
        x_t = jnp.pad(x_t, ((0, 0), (0, padded - batch)))

    w1, w2, w3 = params["w1"], params["w2"], params["w3"]
    b1 = params["b1"].astype(jnp.float32)
    b2 = params["b2"].astype(jnp.float32)
    b3 = params["b3"].astype(jnp.float32)
    if stream_dtype is not None:
        x_t = x_t.astype(stream_dtype)
        w1, w2, w3 = (w.astype(stream_dtype) for w in (w1, w2, w3))

    grid = (padded // tm,)

    def col_tile(rows):                          # streamed over the batch grid axis
        return pl.BlockSpec((rows, tm), lambda i: (0, i))

    def resident(shape):                         # VMEM-resident across all grid steps
        return pl.BlockSpec(shape, lambda i: (0, 0))

    # TODO(synk): if xprof shows exposed DMA, add pipeline_mode=pl.Buffered(3) to the x spec.
    out_t = pl.pallas_call(
        mlp_kernel,
        out_shape=jax.ShapeDtypeStruct((act_dim, padded), jnp.float32),
        grid=grid,
        in_specs=[
            col_tile(obs_dim),
            resident(w1.shape), resident(b1.shape),
            resident(w2.shape), resident(b2.shape),
            resident(w3.shape), resident(b3.shape),
        ],
        out_specs=col_tile(act_dim),
        compiler_params=pltpu.CompilerParams(dimension_semantics=("parallel",)),
    )(x_t, w1, b1, w2, b2, w3, b3)

    return out_t[:, :batch].T                    # back to [batch, act_dim]


def init_params(key, obs_dim, act_dim):
    """PyTorch nn.Linear-style init, stored PyTorch-layout: W=[out,in], b=[out,1]."""
    dims = [(obs_dim, 64), (64, 32), (32, act_dim)]
    params = {}
    for i, (fan_in, fan_out) in enumerate(dims, start=1):
        key, kw, kb = jax.random.split(key, 3)
        bound = 1.0 / jnp.sqrt(float(fan_in))
        params[f"w{i}"] = jax.random.uniform(
            kw, (fan_out, fan_in), jnp.float32, minval=-bound, maxval=bound)
        params[f"b{i}"] = jax.random.uniform(
            kb, (fan_out, 1), jnp.float32, minval=-bound, maxval=bound)
    return params


def reference_forward(x, params):
    h1 = jnp.maximum(x @ params["w1"].T + params["b1"][:, 0], 0.0)
    h2 = jnp.maximum(h1 @ params["w2"].T + params["b2"][:, 0], 0.0)
    return jnp.tanh(h2 @ params["w3"].T + params["b3"][:, 0])


if __name__ == "__main__":
    obs_dim, act_dim = 16, 4
    key = jax.random.PRNGKey(0)
    key, kx = jax.random.split(key)
    params = init_params(key, obs_dim, act_dim)

    # Small, module-consistent shape.
    batch = 8
    x = jax.random.normal(kx, (batch, obs_dim), jnp.float32)
    out = jax.block_until_ready(custom_policy_forward(x, params))
    ref = reference_forward(x, params)
    assert out.shape == (batch, act_dim)
    assert jnp.allclose(out, ref, atol=1e-5, rtol=1e-5)

    # Exercise a multi-step grid + partial-tile padding (batch=300, tile=128 -> grid=3).
    key, kx2 = jax.random.split(key)
    batch2 = 300
    x2 = jax.random.normal(kx2, (batch2, obs_dim), jnp.float32)
    out2 = jax.block_until_ready(custom_policy_forward(x2, params, block_batch=128))
    ref2 = reference_forward(x2, params)
    assert out2.shape == (batch2, act_dim)
    assert jnp.allclose(out2, ref2, atol=1e-5, rtol=1e-5)

    # bf16 streaming of x/weights (f32 accumulation) — looser tolerance.
    out3 = jax.block_until_ready(
        custom_policy_forward(x2, params, block_batch=128, stream_dtype=jnp.bfloat16))
    assert jnp.allclose(out3, ref2, atol=5e-2, rtol=5e-2)

    print("KERNEL_OK")
</pallas_src>

<mosaic_0001>
module attributes {stable_mosaic.version = 11 : i64} {
  func.func @mlp_kernel(%arg0: i32, %arg1: memref<16x128xf32, #tpu.memory_space<vmem>>, %arg2: memref<64x16xf32, #tpu.memory_space<vmem>>, %arg3: memref<64x1xf32, #tpu.memory_space<vmem>>, %arg4: memref<32x64xf32, #tpu.memory_space<vmem>>, %arg5: memref<32x1xf32, #tpu.memory_space<vmem>>, %arg6: memref<4x32xf32, #tpu.memory_space<vmem>>, %arg7: memref<4x1xf32, #tpu.memory_space<vmem>>, %arg8: memref<4x128xf32, #tpu.memory_space<vmem>>) attributes {dimension_semantics = [#tpu.dimension_semantics<parallel>], iteration_bounds = array<i64: 1>, scalar_prefetch = 0 : i64, scratch_operands = 0 : i64, tpu.core_type = #tpu.core_type<tc>, window_params = [{transform_indices = @transform_0, window_bounds = array<i64: 16, 128>}, {pipeline_mode = #tpu.pipeline_mode<synchronous>, transform_indices = @transform_1, window_bounds = array<i64: 64, 16>}, {pipeline_mode = #tpu.pipeline_mode<synchronous>, transform_indices = @transform_2, window_bounds = array<i64: 64, 1>}, {pipeline_mode = #tpu.pipeline_mode<synchronous>, transform_indices = @transform_3, window_bounds = array<i64: 32, 64>}, {pipeline_mode = #tpu.pipeline_mode<synchronous>, transform_indices = @transform_4, window_bounds = array<i64: 32, 1>}, {pipeline_mode = #tpu.pipeline_mode<synchronous>, transform_indices = @transform_5, window_bounds = array<i64: 4, 32>}, {pipeline_mode = #tpu.pipeline_mode<synchronous>, transform_indices = @transform_6, window_bounds = array<i64: 4, 1>}, {transform_indices = @transform_7, window_bounds = array<i64: 4, 128>}]} {
    %c0 = arith.constant 0 : index
    %c0_0 = arith.constant 0 : index
    %0 = vector.load %arg1[%c0, %c0_0] : memref<16x128xf32, #tpu.memory_space<vmem>>, vector<16x128xf32>
    %c0_1 = arith.constant 0 : index
    %c0_2 = arith.constant 0 : index
    %1 = vector.load %arg2[%c0_1, %c0_2] : memref<64x16xf32, #tpu.memory_space<vmem>>, vector<64x16xf32>
    %cst = arith.constant dense<0.000000e+00> : vector<64x128xf32>
    %2 = tpu.matmul %1, %0, %cst {dimension_numbers = #tpu.dot_dimension_numbers<[1], [0], [0], [1], [0, 0, 1, 1], [], []>} : vector<64x16xf32>, vector<16x128xf32>, vector<64x128xf32> -> vector<64x128xf32>
    %c0_3 = arith.constant 0 : index
    %c0_4 = arith.constant 0 : index
    %3 = vector.load %arg3[%c0_3, %c0_4] : memref<64x1xf32, #tpu.memory_space<vmem>>, vector<64x1xf32>
    %4 = vector.broadcast %3 : vector<64x1xf32> to vector<64x128xf32>
    %5 = arith.addf %2, %4 : vector<64x128xf32>
    %cst_5 = arith.constant 0.000000e+00 : f32
    %6 = vector.broadcast %cst_5 : f32 to vector<64x128xf32>
    %7 = arith.maximumf %5, %6 : vector<64x128xf32>
    %c0_6 = arith.constant 0 : index
    %c0_7 = arith.constant 0 : index
    %8 = vector.load %arg4[%c0_6, %c0_7] : memref<32x64xf32, #tpu.memory_space<vmem>>, vector<32x64xf32>
    %cst_8 = arith.constant dense<0.000000e+00> : vector<32x128xf32>
    %9 = tpu.matmul %8, %7, %cst_8 {dimension_numbers = #tpu.dot_dimension_numbers<[1], [0], [0], [1], [0, 0, 1, 1], [], []>} : vector<32x64xf32>, vector<64x128xf32>, vector<32x128xf32> -> vector<32x128xf32>
    %c0_9 = arith.constant 0 : index
    %c0_10 = arith.constant 0 : index
    %10 = vector.load %arg5[%c0_9, %c0_10] : memref<32x1xf32, #tpu.memory_space<vmem>>, vector<32x1xf32>
    %11 = vector.broadcast %10 : vector<32x1xf32> to vector<32x128xf32>
    %12 = arith.addf %9, %11 : vector<32x128xf32>
    %cst_11 = arith.constant 0.000000e+00 : f32
    %13 = vector.broadcast %cst_11 : f32 to vector<32x128xf32>
    %14 = arith.maximumf %12, %13 : vector<32x128xf32>
    %c0_12 = arith.constant 0 : index
    %c0_13 = arith.constant 0 : index
    %15 = vector.load %arg6[%c0_12, %c0_13] : memref<4x32xf32, #tpu.memory_space<vmem>>, vector<4x32xf32>
    %cst_14 = arith.constant dense<0.000000e+00> : vector<4x128xf32>
    %16 = tpu.matmul %15, %14, %cst_14 {dimension_numbers = #tpu.dot_dimension_numbers<[1], [0], [0], [1], [0, 0, 1, 1], [], []>} : vector<4x32xf32>, vector<32x128xf32>, vector<4x128xf32> -> vector<4x128xf32>
    %c0_15 = arith.constant 0 : index
    %c0_16 = arith.constant 0 : index
    %17 = vector.load %arg7[%c0_15, %c0_16] : memref<4x1xf32, #tpu.memory_space<vmem>>, vector<4x1xf32>
    %18 = vector.broadcast %17 : vector<4x1xf32> to vector<4x128xf32>
    %19 = arith.addf %16, %18 : vector<4x128xf32>
    %20 = math.tanh %19 : vector<4x128xf32>
    %c0_17 = arith.constant 0 : index
    %c0_18 = arith.constant 0 : index
    %21 = vector.load %arg8[%c0_17, %c0_18] : memref<4x128xf32, #tpu.memory_space<vmem>>, vector<4x128xf32>
    tpu.vector_store %arg8[%c0_17, %c0_18], %20 {strides = array<i32>} : memref<4x128xf32, #tpu.memory_space<vmem>>, vector<4x128xf32>,
    return
  }
  func.func @transform_0(%arg0: i32) -> (i32, i32) {
    %c0_i32 = arith.constant 0 : i32
    %c0_i32_0 = arith.constant 0 : i32
    return %c0_i32, %arg0 : i32, i32
  }
  func.func @transform_1(%arg0: i32) -> (i32, i32) {
    %c0_i32 = arith.constant 0 : i32
    %c0_i32_0 = arith.constant 0 : i32
    %c0_i32_1 = arith.constant 0 : i32
    return %c0_i32, %c0_i32_0 : i32, i32
  }
  func.func @transform_2(%arg0: i32) -> (i32, i32) {
    %c0_i32 = arith.constant 0 : i32
    %c0_i32_0 = arith.constant 0 : i32
    %c0_i32_1 = arith.constant 0 : i32
    return %c0_i32, %c0_i32_0 : i32, i32
  }
  func.func @transform_3(%arg0: i32) -> (i32, i32) {
    %c0_i32 = arith.constant 0 : i32
    %c0_i32_0 = arith.constant 0 : i32
    %c0_i32_1 = arith.constant 0 : i32
    return %c0_i32, %c0_i32_0 : i32, i32
  }
  func.func @transform_4(%arg0: i32) -> (i32, i32) {
    %c0_i32 = arith.constant 0 : i32
    %c0_i32_0 = arith.constant 0 : i32
    %c0_i32_1 = arith.constant 0 : i32
    return %c0_i32, %c0_i32_0 : i32, i32
  }
  func.func @transform_5(%arg0: i32) -> (i32, i32) {
    %c0_i32 = arith.constant 0 : i32
    %c0_i32_0 = arith.constant 0 : i32
    %c0_i32_1 = arith.constant 0 : i32
    return %c0_i32, %c0_i32_0 : i32, i32
  }
  func.func @transform_6(%arg0: i32) -> (i32, i32) {
    %c0_i32 = arith.constant 0 : i32
    %c0_i32_0 = arith.constant 0 : i32
    %c0_i32_1 = arith.constant 0 : i32
    return %c0_i32, %c0_i32_0 : i32, i32
  }
  func.func @transform_7(%arg0: i32) -> (i32, i32) {
    %c0_i32 = arith.constant 0 : i32
    %c0_i32_0 = arith.constant 0 : i32
    return %c0_i32, %arg0 : i32, i32
  }
}

</mosaic_0001>

<bundles_post_ra>
// kernel: tpu_custom_call.1
= control target key start
LH: loop header
LB: loop body
LE: loop exit
PB: predicated region body
PF: predicated region fallthrough
CT: control target
= control target key end

     0   :  { %vm85_vm0 = vcmask 130048   ;;  %v338_v3 = vmov 0   ;;  %s475_s0 = inlined_call_operand.vmem [shape: f32[16,128], index: 0, kind: input, shape index: {}]   ;;  %s476_s1 = inlined_call_operand.vmem [shape: f32[64,16], index: 1, kind: input, shape index: {}]   ;;  %s477_s2 = inlined_call_operand.vmem [shape: f32[64,1], index: 2, kind: input, shape index: {}]   ;;  %s478_s3 = inlined_call_operand.vmem [shape: f32[32,64], index: 3, kind: input, shape index: {}]   ;;  %s479_s4 = inlined_call_operand.vmem [shape: f32[32,1], index: 4, kind: input, shape index: {}]   ;;  %s480_s5 = inlined_call_operand.vmem [shape: f32[4,32], index: 5, kind: input, shape index: {}]   ;;  %s481_s6 = inlined_call_operand.vmem [shape: f32[4,1], index: 6, kind: input, shape index: {}]   ;;  %s482_s7 = inlined_call_operand.hbm [shape: f32[4,128], index: 7, kind: output, shape index: {}]  }
   0x1   :  { %v28_v0 = vld [vmem:[%s475_s0 + $0x8] sm:$0xff]  ;;  %v27_v1 = vld [vmem:[%s475_s0] sm:$0xff]  ;;  %307 = vset.pattern.permute.xlu0 %v338_v3  ;;  %v44_v4 = vld [vmem:[%s477_s2 + $0x38] sm:$0xff]  ;;  %308 = vset.pattern.permute.xlu1 %v338_v3 }
   0x2   :  { %295 = vmatpush.msra.mxu3 %v28_v0  ;;  %v33_v2 = vld [vmem:[%s476_s1 + $0x20] sm:$0xff]  ;;  %82 = vperm.xlu0 %307, %v44_v4   ;;  %v42_v6 = vld [vmem:[%s477_s2 + $0x28] sm:$0xff]  ;;  %v40_v7 = vld [vmem:[%s477_s2 + $0x18] sm:$0xff] }
   0x3   :  { %124 = vmatpush.msra.mxu0 %v28_v0  ;;  %v29_v5 = vld [vmem:[%s476_s1] sm:$0xff]  ;;  %72 = vperm.xlu1 %308, %v42_v6   ;;  %v43_v8 = vld [vmem:[%s477_s2 + $0x30] sm:$0xff] }
   0x4   :  { %296 = vmatpush.msra.mxu3 %v27_v1  ;;  %309 = vset.pattern.permute.xlu2 %v338_v3 }
   0x5   :  { %286 = vmatmul.msk.f32.vlgmr.msra.gmra.mxu3 %vm85_vm0, %v33_v2  ;;  %125 = vmatpush.msra.mxu0 %v27_v1 }
   0x6   :  { %282 = vmatmul.msk.f32.vlgmr.msra.gmra.mxu0 %vm85_vm0, %v29_v5  ;;  %62 = vperm.xlu2 %309, %v40_v7  }
   0x7   :  { %12 = vsyncpa [#allocation3], 0  ;;  %v34_v9 = vld [vmem:[%s476_s1 + $0x28] sm:$0xff]  ;;  %v41_v11 = vld [vmem:[%s477_s2 + $0x20] sm:$0xff]  ;;  %vm187_vm1 = vcmask 523264   ;;  %vm240_vm2 = vcmask 261120  }
   0x8   :  { %v30_v10 = vld [vmem:[%s476_s1 + $0x8] sm:$0xff]  ;;  %v39_v12 = vld [vmem:[%s477_s2 + $0x10] sm:$0xff]  ;;  %v37_v16 = vld [vmem:[%s477_s2] sm:$0xff]  ;;  %s339_s27 = smov [#allocation2]   ;;  %s273_s8 = sshll.u32 %s482_s7, 4  ;;  %s274_s8 = int_to_ptr.hbm [resolvable:$true] %s273_s8 }
   0x9   :  { %v38_v13 = vld [vmem:[%s477_s2 + $0x8] sm:$0xff]  ;;  %v35_v14 = vld [vmem:[%s476_s1 + $0x30] sm:$0xff]  ;;  %v166_v17 = vld [vmem:[%s479_s4 + $0x18] sm:$0xff]  ;;  %s271_s28 = sshll.u32 %s339_s27, 4  ;;  %s272_s28 = int_to_ptr.vmem [resolvable:$true] %s271_s28 }
   0xa   :  { %77 = vperm.xlu0 %307, %v43_v8   ;;  %v31_v15 = vld [vmem:[%s476_s1 + $0x10] sm:$0xff]  ;;  %v36_v19 = vld [vmem:[%s476_s1 + $0x38] sm:$0xff]  ;;  %v164_v21 = vld [vmem:[%s479_s4 + $0x8] sm:$0xff] }
   0xb   :  { %67 = vperm.xlu1 %308, %v41_v11   ;;  %v165_v18 = vld [vmem:[%s479_s4 + $0x10] sm:$0xff]  ;;  %v32_v20 = vld [vmem:[%s476_s1 + $0x18] sm:$0xff]  ;;  %v163_v22 = vld [vmem:[%s479_s4] sm:$0xff] }
   0xc   :  { %v234_v23 = vld [vmem:[%s481_s6] sm:$0xf]  ;;  %v162_v57 = vld [vmem:[%s478_s3 + $0x18] sm:$0xff]  ;;  %v160_v58 = vld [vmem:[%s478_s3 + $0x8] sm:$0xff] }
   0xd   :  { %287 = vmatmul.msk.f32.gmra.mxu3 %vm85_vm0, %v34_v9  ;;  %v159_v56 = vld [vmem:[%s478_s3] sm:$0xff]  ;;  %v161_v59 = vld [vmem:[%s478_s3 + $0x10] sm:$0xff] }
   0xe   :  { %283 = vmatmul.msk.f32.gmra.mxu0 %vm85_vm0, %v30_v10  ;;  %57 = vperm.xlu2 %309, %v39_v12   ;;  %v233_v12 = vld [vmem:[%s480_s5] sm:$0xf] }
  0x12   :  { %52 = vperm.xlu0 %307, %v38_v13  }
  0x13   :  { %47 = vperm.xlu1 %308, %v37_v16  }
  0x15   :  { %288 = vmatmul.msk.f32.gmra.mxu3 %vm85_vm0, %v35_v14 }
  0x16   :  { %284 = vmatmul.msk.f32.gmra.mxu0 %vm85_vm0, %v31_v15  ;;  %184 = vperm.xlu2 %309, %v166_v17  }
  0x1a   :  { %179 = vperm.xlu0 %307, %v165_v18  }
  0x1b   :  { %174 = vperm.xlu1 %308, %v164_v21  }
  0x1d   :  { %289 = vmatmul.msk.f32.gmra.mxu3 %vm85_vm0, %v36_v19 }
  0x1e   :  { %285 = vmatmul.msk.f32.gmra.mxu0 %vm85_vm0, %v32_v20  ;;  %169 = vperm.xlu2 %309, %v163_v22  }
  0x22   :  { %237 = vperm.xlu0 %307, %v234_v23  }
  0x60   :  { %v63_v32 = vpop.permute.xlu2 %62 }
  0x68   :  { %v58_v45 = vpop.permute.xlu2 %57 }
  0x70   :  { %v185_v61 = vpop.permute.xlu2 %184 }
  0x74   :  { %v83_v28 = vpop.permute.xlu0 %82 }
  0x75   :  { %v73_v29 = vpop.permute.xlu1 %72 }
  0x78   :  { %v170_v7 = vpop.permute.xlu2 %169 }
  0x7c   :  { %v78_v33 = vpop.permute.xlu0 %77 }
  0x7d   :  { %v68_v34 = vpop.permute.xlu1 %67 }
  0x83   :  { %v127_v24 = vpop.f32.mrf.mxu0 }
  0x84   :  { %v53_v48 = vpop.permute.xlu0 %52 }
  0x85   :  { %v48_v49 = vpop.permute.xlu1 %47 }
  0x86   :  { %v128_v52 = vadd.f32 %v127_v24, %v48_v49 }
  0x88   :  { %v139_v25 = vpop.f32.mrf.mxu3  ;;  %v151_v55 = vmax.f32 %v128_v52, 0.0 }
  0x89   :  { %v140_v41 = vadd.f32 %v139_v25, %v68_v34 }
  0x8b   :  { %v130_v27 = vpop.f32.mrf.mxu0  ;;  %v155_v46 = vmax.f32 %v140_v41, 0.0 }
  0x8c   :  { %v131_v50 = vadd.f32 %v130_v27, %v53_v48  ;;  %v180_v2 = vpop.permute.xlu0 %179 }
  0x8d   :  { %v175_v3 = vpop.permute.xlu1 %174 }
  0x8e   :  { %v152_v54 = vmax.f32 %v131_v50, 0.0 }
  0x90   :  { %v142_v26 = vpop.f32.mrf.mxu3 }
  0x91   :  { %v143_v38 = vadd.f32 %v142_v26, %v73_v29 }
  0x93   :  { %v133_v31 = vpop.f32.mrf.mxu0  ;;  %v156_v43 = vmax.f32 %v143_v38, 0.0 }
  0x94   :  { %v134_v47 = vadd.f32 %v133_v31, %v58_v45  ;;  %v238_v13 = vpop.permute.xlu0 %237 }
  0x96   :  { %v153_v53 = vmax.f32 %v134_v47, 0.0 }
  0x98   :  { %v145_v30 = vpop.f32.mrf.mxu3 }
  0x99   :  { %v146_v36 = vadd.f32 %v145_v30, %v78_v33 }
  0x9b   :  { %v136_v40 = vpop.f32.mrf.mxu0  ;;  %v157_v42 = vmax.f32 %v146_v36, 0.0 }
  0x9c   :  { %v137_v44 = vadd.f32 %v136_v40, %v63_v32 }
  0x9e   :  { %v154_v51 = vmax.f32 %v137_v44, 0.0 }
  0xa0   :  { %v148_v35 = vpop.f32.mrf.mxu3 }
  0xa1   :  { %v149_v37 = vadd.f32 %v148_v35, %v83_v28 }
  0xa3   :  { %v158_v39 = vmax.f32 %v149_v37, 0.0 }
  0xa5   :  { %208 = vmatpush.msra.mxu1 %v158_v39  ;;  %297 = vmatpush.msra.mxu2 %v158_v39 }
  0xa7   :  { %209 = vmatpush.msra.mxu1 %v157_v42  ;;  %298 = vmatpush.msra.mxu2 %v157_v42 }
  0xa9   :  { %210 = vmatpush.msra.mxu1 %v156_v43  ;;  %299 = vmatpush.msra.mxu2 %v156_v43 }
  0xab   :  { %211 = vmatpush.msra.mxu1 %v155_v46  ;;  %300 = vmatpush.msra.mxu2 %v155_v46 }
  0xad   :  { %212 = vmatpush.msra.mxu1 %v154_v51  ;;  %301 = vmatpush.msra.mxu2 %v154_v51 }
  0xaf   :  { %213 = vmatpush.msra.mxu1 %v153_v53  ;;  %302 = vmatpush.msra.mxu2 %v153_v53 }
  0xb1   :  { %214 = vmatpush.msra.mxu1 %v152_v54  ;;  %303 = vmatpush.msra.mxu2 %v152_v54 }
  0xb3   :  { %215 = vmatpush.msra.mxu1 %v151_v55  ;;  %304 = vmatpush.msra.mxu2 %v151_v55 }
  0xb4   :  { %290 = vmatmul.msk.f32.vlgmr.msra.gmra.mxu1 %vm187_vm1, %v159_v56  ;;  %293 = vmatmul.msk.f32.vlgmr.msra.gmra.mxu2 %vm187_vm1, %v162_v57 }
  0xbc   :  { %291 = vmatmul.msk.f32.gmra.mxu1 %vm187_vm1, %v160_v58 }
  0xc4   :  { %292 = vmatmul.msk.f32.gmra.mxu1 %vm187_vm1, %v161_v59 }
 0x131   :  { %v217_v60 = vpop.f32.mrf.mxu1 }
 0x132   :  { %v218_v8 = vadd.f32 %v217_v60, %v170_v7 }
 0x134   :  { %v229_v11 = vmax.f32 %v218_v8, 0.0 }
 0x137   :  { %v226_v62 = vpop.f32.mrf.mxu2 }
 0x138   :  { %v227_v63 = vadd.f32 %v226_v62, %v185_v61 }
 0x139   :  { %v220_v0 = vpop.f32.mrf.mxu1 }
 0x13a   :  { %v232_v1 = vmax.f32 %v227_v63, 0.0  ;;  %v221_v5 = vadd.f32 %v220_v0, %v175_v3 }
 0x13c   :  { %256 = vmatpush.msrb.mxu2 %v232_v1  ;;  %v230_v10 = vmax.f32 %v221_v5, 0.0 }
 0x141   :  { %v223_v4 = vpop.f32.mrf.mxu1 }
 0x142   :  { %v224_v6 = vadd.f32 %v223_v4, %v180_v2 }
 0x144   :  { %v231_v9 = vmax.f32 %v224_v6, 0.0 }
 0x146   :  { %257 = vmatpush.msrb.mxu2 %v231_v9 }
 0x148   :  { %258 = vmatpush.msrb.mxu2 %v230_v10 }
 0x14a   :  { %259 = vmatpush.msrb.mxu2 %v229_v11 }
 0x14b   :  { %294 = vmatmul.msk.f32.vlgmr.msrb.gmra.mxu2 %vm240_vm2, %v233_v12 }
 0x1ce   :  { %v261_v14 = vpop.f32.mrf.mxu2 }
 0x1cf   :  { %v262_v15 = vadd.f32 %v261_v14, %v238_v13 }
 0x1d1   :  { %310 = vtanh.f32 %v262_v15 }
 0x1d7   :  { %v311_v16 = vpop.eup %310 }
 0x1d8   :  { %265 = vst [vmem:[#allocation2] sm:$0xf] %v311_v16 }
 0x1d9   :  { %276 = dma.vmem_to_hbm [thread:$0]  %s272_s28, 64, %s274_s8, [#allocation3]  }
 0x1da   :  { %336 = dma.done.wait [#allocation3], 64  }
 0x1db   :  { %337 = vsyncadd [#allocation3], 4294967232 }
 0x1dc   :  { %281 = vsyncpa [#allocation3], 1 }

</bundles_post_ra>
